<compile_context>
chip_gen: v5e
topology: v5e:2x2
jax: 0.10.0
libtpu: 0.0.40
codegen_flags: <defaults>
</compile_context>

<pallas_src>
import jax
import jax.numpy as jnp
from jax.experimental import pallas as pl
from jax.experimental.pallas import tpu as pltpu


# ----------------------------------------------------------------------------
# Fused Pallas kernel: all layers + pattern_proj + metric partial sums
# ----------------------------------------------------------------------------
def fused_arithmetic_pattern_kernel(
    x_ref,       # (TN, D)       f32   row tile of flattened input activations
    wA_ref,      # (L, D, 2H)    bf16  packed [w1h | wl1]   (height_map.0, l_function.0)
    bA_ref,      # (L, 1, 2H)    f32   packed [b1h | bl1]
    wB_ref,      # (L, 2H, 3D)   bf16  [[w2h, 0, w2h@wf], [0, wl2, 0]]
    bB_ref,      # (L, 1, 3D)    f32   [b2h | bl2 | b2h@wf + bf]
    csum_ref,    # (L, 1, D)     f32   coupling.sum(0) (hoisted einsum)
    wp_ref,      # (D, D)        bf16  pattern_proj weight
    bp_ref,      # (1, D)        f32   pattern_proj bias
    out_ref,     # (TN, D)       f32   pattern_proj(current) for this row tile
    stats_ref,   # (1, 4L, D)    f32   per-layer row-reduced partial sums:
                 #                     [sum(cur), sum(cur^2), sum(ff^2), sum(lv^2)]
):
    num_layers = wA_ref.shape[0]
    d = x_ref.shape[1]

    cur = x_ref[...]                                  # fp32 activations
    stats_rows = []
    for l in range(num_layers):                       # unrolled; static weight indexing
        # packed height_map.0 / l_function.0 + tanh  -> [h1 | l1]   (TN, 2H)
        hl = jnp.tanh(
            jnp.dot(cur.astype(jnp.bfloat16), wA_ref[l],
                    preferred_element_type=jnp.float32)
            + bA_ref[l]
        )
        # packed height_map.2 / l_function.2 / folded flow -> [height | l_values | base_flow]
        hd = jnp.dot(hl.astype(jnp.bfloat16), wB_ref[l],
                     preferred_element_type=jnp.float32) + bB_ref[l]
        height = hd[:, :d]                            # in-tile lane slices (one 128-lane vreg)
        l_values = hd[:, d:2 * d]
        base_flow = hd[:, 2 * d:]

        # coupled_flow = coupling.sum(0) * base_flow  (exact 'ph,bsh->bsh' rewrite)
        flow_field = csum_ref[l] * base_flow + 0.1 * l_values
        cur = height + flow_field                     # height_coords after one dynamics step

        # metric partials kept in registers; single store after the loop
        stats_rows.append(jnp.sum(cur, axis=0, keepdims=True))
        stats_rows.append(jnp.sum(cur * cur, axis=0, keepdims=True))
        stats_rows.append(jnp.sum(flow_field * flow_field, axis=0, keepdims=True))
        stats_rows.append(jnp.sum(l_values * l_values, axis=0, keepdims=True))

    stats_ref[...] = jnp.concatenate(stats_rows, axis=0)[None, :, :]

    # final pattern_proj
    out_ref[...] = (
        jnp.dot(cur.astype(jnp.bfloat16), wp_ref[...],
                preferred_element_type=jnp.float32)
        + bp_ref[...]
    ).astype(out_ref.dtype)


# ----------------------------------------------------------------------------
# One-time parameter packing (outside jit / per-call path)
# ----------------------------------------------------------------------------
def pack_arithmetic_pattern_params(layer_params, proj_w, proj_b):
    """Pack per-layer weights once at init; returns a pytree for the jitted forward."""
    d = proj_w.shape[0]
    h = d // 2
    z = jnp.zeros((h, d), jnp.float32)
    wA, bA, wB, bB, csum, cnorm = [], [], [], [], [], []
    for p in layer_params:
        wA.append(jnp.concatenate([p["w1h"], p["wl1"]], axis=1))           # (D, 2H)
        bA.append(jnp.concatenate([p["b1h"], p["bl1"]], axis=1))           # (1, 2H)
        w2h_wf = p["w2h"] @ p["wf"]                                         # fold flow matmul
        b_flow = p["b2h"] @ p["wf"] + p["bf"]
        top = jnp.concatenate([p["w2h"], z, w2h_wf], axis=1)                # (H, 3D)
        bot = jnp.concatenate([z, p["wl2"], z], axis=1)                     # (H, 3D)
        wB.append(jnp.concatenate([top, bot], axis=0))                      # (2H, 3D)
        bB.append(jnp.concatenate([p["b2h"], p["bl2"], b_flow], axis=1))    # (1, 3D)
        csum.append(jnp.sum(p["coupling"], axis=0, keepdims=True))          # (1, D)
        cnorm.append(jnp.linalg.norm(p["coupling"]))
    return {
        "wA": jnp.stack(wA).astype(jnp.bfloat16),
        "bA": jnp.stack(bA).astype(jnp.float32),
        "wB": jnp.stack(wB).astype(jnp.bfloat16),
        "bB": jnp.stack(bB).astype(jnp.float32),
        "csum": jnp.stack(csum).astype(jnp.float32),
        "wp": proj_w.astype(jnp.bfloat16),
        "bp": proj_b.astype(jnp.float32),
        "coupling_norm": jnp.stack(cnorm),
    }


def _pick_tile_n(n, max_tile=512):
    """Largest row tile <= max_tile that is a multiple of 8 and divides n; else full."""
    if n <= max_tile:
        return n
    t = max_tile - (max_tile % 8)
    while t >= 8:
        if n % t == 0:
            return t
        t -= 8
    return n


# ----------------------------------------------------------------------------
# Jitted forward: one pallas_call + vectorized metric finish
# ----------------------------------------------------------------------------
def arithmetic_pattern_forward(x, packed):
    b, s, d = x.shape
    n = b * s
    num_layers = packed["wA"].shape[0]
    h2 = packed["wA"].shape[2]

    tile_n = _pick_tile_n(n)
    num_tiles = n // tile_n

    x2d = x.reshape(n, d)

    out2d, stats = pl.pallas_call(
        fused_arithmetic_pattern_kernel,
        grid=(num_tiles,),
        in_specs=[
            pl.BlockSpec((tile_n, d), lambda i: (i, 0)),
            pl.BlockSpec((num_layers, d, h2), lambda i: (0, 0, 0)),
            pl.BlockSpec((num_layers, 1, h2), lambda i: (0, 0, 0)),
            pl.BlockSpec((num_layers, h2, 3 * d), lambda i: (0, 0, 0)),
            pl.BlockSpec((num_layers, 1, 3 * d), lambda i: (0, 0, 0)),
            pl.BlockSpec((num_layers, 1, d), lambda i: (0, 0, 0)),
            pl.BlockSpec((d, d), lambda i: (0, 0)),
            pl.BlockSpec((1, d), lambda i: (0, 0)),
        ],
        out_specs=(
            pl.BlockSpec((tile_n, d), lambda i: (i, 0)),
            pl.BlockSpec((1, 4 * num_layers, d), lambda i: (i, 0, 0)),
        ),
        out_shape=(
            jax.ShapeDtypeStruct((n, d), jnp.float32),
            jax.ShapeDtypeStruct((num_tiles, 4 * num_layers, d), jnp.float32),
        ),
        compiler_params=pltpu.CompilerParams(
            # independent row tiles: lets megacore (v7x) shard when num_tiles > 1;
            # at grid=(1,) this is a no-op.
            dimension_semantics=("parallel",),
        ),
    )(x2d, packed["wA"], packed["bA"], packed["wB"], packed["bB"],
      packed["csum"], packed["wp"], packed["bp"])

    # --- finish the tiny per-layer metrics, vectorized over layers ---
    s4 = stats.sum(axis=0).reshape(num_layers, 4, d).sum(axis=-1)   # (L, 4)
    n_el = float(n * d)
    sum_cur, ssq_cur = s4[:, 0], s4[:, 1]
    ssq_ff, ssq_lv = s4[:, 2], s4[:, 3]
    norm_cur = jnp.sqrt(ssq_cur)
    mean_cur = sum_cur / n_el
    # torch.std() uses Bessel's correction (ddof=1)
    var = jnp.maximum(ssq_cur - sum_cur * sum_cur / n_el, 0.0) / (n_el - 1.0)
    std_cur = jnp.sqrt(var)
    flow_norm = jnp.sqrt(ssq_ff)
    lv_norm = jnp.sqrt(ssq_lv)

    metrics = []
    for l in range(num_layers):
        metrics.append({
            "layer_norm": norm_cur[l],
            "layer_mean": mean_cur[l],
            "layer_std": std_cur[l],
            "height_norm": norm_cur[l],       # == norm of height_coords after the step
            "flow_norm": flow_norm[l],
            "l_values_norm": lv_norm[l],
            "coupling_norm": packed["coupling_norm"][l],
        })
    return out2d.reshape(b, s, d), metrics


# ----------------------------------------------------------------------------
# Deterministic parameter initialization (synthetic, torch-Linear-like ranges)
# ----------------------------------------------------------------------------
def init_linear(key, fan_in, fan_out):
    kw, kb = jax.random.split(key)
    bound = 1.0 / float(fan_in) ** 0.5
    w = jax.random.uniform(kw, (fan_in, fan_out), jnp.float32, -bound, bound)
    b = jax.random.uniform(kb, (1, fan_out), jnp.float32, -bound, bound)
    return w, b


def init_dynamics_params(key, d, num_primes=8):
    h = d // 2
    keys = jax.random.split(key, 6)
    w1h, b1h = init_linear(keys[0], d, h)       # height_map.0
    w2h, b2h = init_linear(keys[1], h, d)       # height_map.2
    wf, bf = init_linear(keys[2], d, d)         # flow
    wl1, bl1 = init_linear(keys[3], d, h)       # l_function.0
    wl2, bl2 = init_linear(keys[4], h, d)       # l_function.2
    coupling = jax.random.normal(keys[5], (num_primes, d), jnp.float32) / (
        float(num_primes * d) ** 0.5
    )
    return {
        "w1h": w1h, "b1h": b1h, "w2h": w2h, "b2h": b2h,
        "wf": wf, "bf": bf,
        "wl1": wl1, "bl1": bl1, "wl2": wl2, "bl2": bl2,
        "coupling": coupling,
    }


if __name__ == "__main__":
    # input_dim == hidden_dim == motive_rank == height_dim == D (required by reference forward).
    D = 16
    B, S = 2, 8
    NUM_LAYERS = 3

    x = jax.random.normal(jax.random.PRNGKey(0), (B, S, D), jnp.float32)

    pkeys = jax.random.split(jax.random.PRNGKey(1), NUM_LAYERS + 1)
    layer_params = [init_dynamics_params(pkeys[i], D) for i in range(NUM_LAYERS)]
    proj_w, proj_b = init_linear(pkeys[NUM_LAYERS], D, D)

    # Pack weights ONCE, outside the jitted forward (perf review item #2).
    packed = pack_arithmetic_pattern_params(layer_params, proj_w, proj_b)
    packed = jax.tree_util.tree_map(jax.block_until_ready, packed)

    fwd = jax.jit(arithmetic_pattern_forward)
    out, metrics = fwd(x, packed)
    out = jax.block_until_ready(out)
    jax.block_until_ready(jax.tree_util.tree_leaves(metrics))

    assert out.shape == (B, S, D)
    assert len(metrics) == NUM_LAYERS
    print("KERNEL_OK")
</pallas_src>

<mosaic_0001>
module attributes {stable_mosaic.version = 11 : i64} {
  func.func @fused_arithmetic_pattern_kernel(%arg0: i32, %arg1: memref<16x16xf32, #tpu.memory_space<vmem>>, %arg2: memref<3x16x16xbf16, #tpu.memory_space<vmem>>, %arg3: memref<3x1x16xf32, #tpu.memory_space<vmem>>, %arg4: memref<3x16x48xbf16, #tpu.memory_space<vmem>>, %arg5: memref<3x1x48xf32, #tpu.memory_space<vmem>>, %arg6: memref<3x1x16xf32, #tpu.memory_space<vmem>>, %arg7: memref<16x16xbf16, #tpu.memory_space<vmem>>, %arg8: memref<1x16xf32, #tpu.memory_space<vmem>>, %arg9: memref<16x16xf32, #tpu.memory_space<vmem>>, %arg10: memref<1x12x16xf32, #tpu.memory_space<vmem>>) attributes {dimension_semantics = [#tpu.dimension_semantics<parallel>], iteration_bounds = array<i64: 1>, scalar_prefetch = 0 : i64, scratch_operands = 0 : i64, tpu.core_type = #tpu.core_type<tc>, window_params = [{transform_indices = @transform_0, window_bounds = array<i64: 16, 16>}, {pipeline_mode = #tpu.pipeline_mode<synchronous>, transform_indices = @transform_1, window_bounds = array<i64: 3, 16, 16>}, {pipeline_mode = #tpu.pipeline_mode<synchronous>, transform_indices = @transform_2, window_bounds = array<i64: 3, 1, 16>}, {pipeline_mode = #tpu.pipeline_mode<synchronous>, transform_indices = @transform_3, window_bounds = array<i64: 3, 16, 48>}, {pipeline_mode = #tpu.pipeline_mode<synchronous>, transform_indices = @transform_4, window_bounds = array<i64: 3, 1, 48>}, {pipeline_mode = #tpu.pipeline_mode<synchronous>, transform_indices = @transform_5, window_bounds = array<i64: 3, 1, 16>}, {pipeline_mode = #tpu.pipeline_mode<synchronous>, transform_indices = @transform_6, window_bounds = array<i64: 16, 16>}, {pipeline_mode = #tpu.pipeline_mode<synchronous>, transform_indices = @transform_7, window_bounds = array<i64: 1, 16>}, {transform_indices = @transform_8, window_bounds = array<i64: 16, 16>}, {transform_indices = @transform_9, window_bounds = array<i64: 1, 12, 16>}]} {
    %c0 = arith.constant 0 : index
    %c0_0 = arith.constant 0 : index
    %0 = vector.load %arg1[%c0, %c0_0] : memref<16x16xf32, #tpu.memory_space<vmem>>, vector<16x16xf32>
    %1 = arith.truncf %0 : vector<16x16xf32> to vector<16x16xbf16>
    %c0_1 = arith.constant 0 : index
    %c0_2 = arith.constant 0 : index
    %c0_3 = arith.constant 0 : index
    %2 = vector.load %arg2[%c0_1, %c0_2, %c0_3] : memref<3x16x16xbf16, #tpu.memory_space<vmem>>, vector<1x16x16xbf16>
    %3 = vector.shape_cast %2 : vector<1x16x16xbf16> to vector<16x16xbf16>
    %cst = arith.constant dense<0.000000e+00> : vector<16x16xf32>
    %4 = tpu.matmul %1, %3, %cst {dimension_numbers = #tpu.dot_dimension_numbers<[1], [0], [0], [1], [0, 0, 1, 1], [], []>} : vector<16x16xbf16>, vector<16x16xbf16>, vector<16x16xf32> -> vector<16x16xf32>
    %c0_4 = arith.constant 0 : index
    %c0_5 = arith.constant 0 : index
    %c0_6 = arith.constant 0 : index
    %5 = vector.load %arg3[%c0_4, %c0_5, %c0_6] : memref<3x1x16xf32, #tpu.memory_space<vmem>>, vector<1x1x16xf32>
    %6 = vector.shape_cast %5 : vector<1x1x16xf32> to vector<1x16xf32>
    %7 = vector.broadcast %6 : vector<1x16xf32> to vector<16x16xf32>
    %8 = arith.addf %4, %7 : vector<16x16xf32>
    %9 = math.tanh %8 : vector<16x16xf32>
    %10 = arith.truncf %9 : vector<16x16xf32> to vector<16x16xbf16>
    %c0_7 = arith.constant 0 : index
    %c0_8 = arith.constant 0 : index
    %c0_9 = arith.constant 0 : index
    %11 = vector.load %arg4[%c0_7, %c0_8, %c0_9] : memref<3x16x48xbf16, #tpu.memory_space<vmem>>, vector<1x16x48xbf16>
    %12 = vector.shape_cast %11 : vector<1x16x48xbf16> to vector<16x48xbf16>
    %cst_10 = arith.constant dense<0.000000e+00> : vector<16x48xf32>
    %13 = tpu.matmul %10, %12, %cst_10 {dimension_numbers = #tpu.dot_dimension_numbers<[1], [0], [0], [1], [0, 0, 1, 1], [], []>} : vector<16x16xbf16>, vector<16x48xbf16>, vector<16x48xf32> -> vector<16x48xf32>
    %c0_11 = arith.constant 0 : index
    %c0_12 = arith.constant 0 : index
    %c0_13 = arith.constant 0 : index
    %14 = vector.load %arg5[%c0_11, %c0_12, %c0_13] : memref<3x1x48xf32, #tpu.memory_space<vmem>>, vector<1x1x48xf32>
    %15 = vector.shape_cast %14 : vector<1x1x48xf32> to vector<1x48xf32>
    %16 = vector.broadcast %15 : vector<1x48xf32> to vector<16x48xf32>
    %17 = arith.addf %13, %16 : vector<16x48xf32>
    %18 = vector.extract_strided_slice %17 {offsets = [0, 0], sizes = [16, 16], strides = [1, 1]} : vector<16x48xf32> to vector<16x16xf32>
    %19 = vector.extract_strided_slice %17 {offsets = [0, 16], sizes = [16, 16], strides = [1, 1]} : vector<16x48xf32> to vector<16x16xf32>
    %20 = vector.extract_strided_slice %17 {offsets = [0, 32], sizes = [16, 16], strides = [1, 1]} : vector<16x48xf32> to vector<16x16xf32>
    %c0_14 = arith.constant 0 : index
    %c0_15 = arith.constant 0 : index
    %c0_16 = arith.constant 0 : index
    %21 = vector.load %arg6[%c0_14, %c0_15, %c0_16] : memref<3x1x16xf32, #tpu.memory_space<vmem>>, vector<1x1x16xf32>
    %22 = vector.shape_cast %21 : vector<1x1x16xf32> to vector<1x16xf32>
    %23 = vector.broadcast %22 : vector<1x16xf32> to vector<16x16xf32>
    %24 = arith.mulf %23, %20 : vector<16x16xf32>
    %cst_17 = arith.constant 1.000000e-01 : f32
    %25 = vector.broadcast %cst_17 : f32 to vector<16x16xf32>
    %26 = arith.mulf %25, %19 : vector<16x16xf32>
    %27 = arith.addf %24, %26 : vector<16x16xf32>
    %28 = arith.addf %18, %27 : vector<16x16xf32>
    %cst_18 = arith.constant dense<0.000000e+00> : vector<16xf32>
    %29 = vector.multi_reduction <add>, %28, %cst_18 [0] : vector<16x16xf32> to vector<16xf32>
    %30 = vector.shape_cast %29 : vector<16xf32> to vector<1x16xf32>
    %31 = arith.mulf %28, %28 : vector<16x16xf32>
    %cst_19 = arith.constant dense<0.000000e+00> : vector<16xf32>
    %32 = vector.multi_reduction <add>, %31, %cst_19 [0] : vector<16x16xf32> to vector<16xf32>
    %33 = vector.shape_cast %32 : vector<16xf32> to vector<1x16xf32>
    %34 = arith.mulf %27, %27 : vector<16x16xf32>
    %cst_20 = arith.constant dense<0.000000e+00> : vector<16xf32>
    %35 = vector.multi_reduction <add>, %34, %cst_20 [0] : vector<16x16xf32> to vector<16xf32>
    %36 = vector.shape_cast %35 : vector<16xf32> to vector<1x16xf32>
    %37 = arith.mulf %19, %19 : vector<16x16xf32>
    %cst_21 = arith.constant dense<0.000000e+00> : vector<16xf32>
    %38 = vector.multi_reduction <add>, %37, %cst_21 [0] : vector<16x16xf32> to vector<16xf32>
    %39 = vector.shape_cast %38 : vector<16xf32> to vector<1x16xf32>
    %40 = arith.truncf %28 : vector<16x16xf32> to vector<16x16xbf16>
    %c1 = arith.constant 1 : index
    %c0_22 = arith.constant 0 : index
    %c0_23 = arith.constant 0 : index
    %41 = vector.load %arg2[%c1, %c0_22, %c0_23] : memref<3x16x16xbf16, #tpu.memory_space<vmem>>, vector<1x16x16xbf16>
    %42 = vector.shape_cast %41 : vector<1x16x16xbf16> to vector<16x16xbf16>
    %cst_24 = arith.constant dense<0.000000e+00> : vector<16x16xf32>
    %43 = tpu.matmul %40, %42, %cst_24 {dimension_numbers = #tpu.dot_dimension_numbers<[1], [0], [0], [1], [0, 0, 1, 1], [], []>} : vector<16x16xbf16>, vector<16x16xbf16>, vector<16x16xf32> -> vector<16x16xf32>
    %c1_25 = arith.constant 1 : index
    %c0_26 = arith.constant 0 : index
    %c0_27 = arith.constant 0 : index
    %44 = vector.load %arg3[%c1_25, %c0_26, %c0_27] : memref<3x1x16xf32, #tpu.memory_space<vmem>>, vector<1x1x16xf32>
    %45 = vector.shape_cast %44 : vector<1x1x16xf32> to vector<1x16xf32>
    %46 = vector.broadcast %45 : vector<1x16xf32> to vector<16x16xf32>
    %47 = arith.addf %43, %46 : vector<16x16xf32>
    %48 = math.tanh %47 : vector<16x16xf32>
    %49 = arith.truncf %48 : vector<16x16xf32> to vector<16x16xbf16>
    %c1_28 = arith.constant 1 : index
    %c0_29 = arith.constant 0 : index
    %c0_30 = arith.constant 0 : index
    %50 = vector.load %arg4[%c1_28, %c0_29, %c0_30] : memref<3x16x48xbf16, #tpu.memory_space<vmem>>, vector<1x16x48xbf16>
    %51 = vector.shape_cast %50 : vector<1x16x48xbf16> to vector<16x48xbf16>
    %cst_31 = arith.constant dense<0.000000e+00> : vector<16x48xf32>
    %52 = tpu.matmul %49, %51, %cst_31 {dimension_numbers = #tpu.dot_dimension_numbers<[1], [0], [0], [1], [0, 0, 1, 1], [], []>} : vector<16x16xbf16>, vector<16x48xbf16>, vector<16x48xf32> -> vector<16x48xf32>
    %c1_32 = arith.constant 1 : index
    %c0_33 = arith.constant 0 : index
    %c0_34 = arith.constant 0 : index
    %53 = vector.load %arg5[%c1_32, %c0_33, %c0_34] : memref<3x1x48xf32, #tpu.memory_space<vmem>>, vector<1x1x48xf32>
    %54 = vector.shape_cast %53 : vector<1x1x48xf32> to vector<1x48xf32>
    %55 = vector.broadcast %54 : vector<1x48xf32> to vector<16x48xf32>
    %56 = arith.addf %52, %55 : vector<16x48xf32>
    %57 = vector.extract_strided_slice %56 {offsets = [0, 0], sizes = [16, 16], strides = [1, 1]} : vector<16x48xf32> to vector<16x16xf32>
    %58 = vector.extract_strided_slice %56 {offsets = [0, 16], sizes = [16, 16], strides = [1, 1]} : vector<16x48xf32> to vector<16x16xf32>
    %59 = vector.extract_strided_slice %56 {offsets = [0, 32], sizes = [16, 16], strides = [1, 1]} : vector<16x48xf32> to vector<16x16xf32>
    %c1_35 = arith.constant 1 : index
    %c0_36 = arith.constant 0 : index
    %c0_37 = arith.constant 0 : index
    %60 = vector.load %arg6[%c1_35, %c0_36, %c0_37] : memref<3x1x16xf32, #tpu.memory_space<vmem>>, vector<1x1x16xf32>
    %61 = vector.shape_cast %60 : vector<1x1x16xf32> to vector<1x16xf32>
    %62 = vector.broadcast %61 : vector<1x16xf32> to vector<16x16xf32>
    %63 = arith.mulf %62, %59 : vector<16x16xf32>
    %cst_38 = arith.constant 1.000000e-01 : f32
    %64 = vector.broadcast %cst_38 : f32 to vector<16x16xf32>
    %65 = arith.mulf %64, %58 : vector<16x16xf32>
    %66 = arith.addf %63, %65 : vector<16x16xf32>
    %67 = arith.addf %57, %66 : vector<16x16xf32>
    %cst_39 = arith.constant dense<0.000000e+00> : vector<16xf32>
    %68 = vector.multi_reduction <add>, %67, %cst_39 [0] : vector<16x16xf32> to vector<16xf32>
    %69 = vector.shape_cast %68 : vector<16xf32> to vector<1x16xf32>
    %70 = arith.mulf %67, %67 : vector<16x16xf32>
    %cst_40 = arith.constant dense<0.000000e+00> : vector<16xf32>
    %71 = vector.multi_reduction <add>, %70, %cst_40 [0] : vector<16x16xf32> to vector<16xf32>
    %72 = vector.shape_cast %71 : vector<16xf32> to vector<1x16xf32>
    %73 = arith.mulf %66, %66 : vector<16x16xf32>
    %cst_41 = arith.constant dense<0.000000e+00> : vector<16xf32>
    %74 = vector.multi_reduction <add>, %73, %cst_41 [0] : vector<16x16xf32> to vector<16xf32>
    %75 = vector.shape_cast %74 : vector<16xf32> to vector<1x16xf32>
    %76 = arith.mulf %58, %58 : vector<16x16xf32>
    %cst_42 = arith.constant dense<0.000000e+00> : vector<16xf32>
    %77 = vector.multi_reduction <add>, %76, %cst_42 [0] : vector<16x16xf32> to vector<16xf32>
    %78 = vector.shape_cast %77 : vector<16xf32> to vector<1x16xf32>
    %79 = arith.truncf %67 : vector<16x16xf32> to vector<16x16xbf16>
    %c2 = arith.constant 2 : index
    %c0_43 = arith.constant 0 : index
    %c0_44 = arith.constant 0 : index
    %80 = vector.load %arg2[%c2, %c0_43, %c0_44] : memref<3x16x16xbf16, #tpu.memory_space<vmem>>, vector<1x16x16xbf16>
    %81 = vector.shape_cast %80 : vector<1x16x16xbf16> to vector<16x16xbf16>
    %cst_45 = arith.constant dense<0.000000e+00> : vector<16x16xf32>
    %82 = tpu.matmul %79, %81, %cst_45 {dimension_numbers = #tpu.dot_dimension_numbers<[1], [0], [0], [1], [0, 0, 1, 1], [], []>} : vector<16x16xbf16>, vector<16x16xbf16>, vector<16x16xf32> -> vector<16x16xf32>
    %c2_46 = arith.constant 2 : index
    %c0_47 = arith.constant 0 : index
    %c0_48 = arith.constant 0 : index
    %83 = vector.load %arg3[%c2_46, %c0_47, %c0_48] : memref<3x1x16xf32, #tpu.memory_space<vmem>>, vector<1x1x16xf32>
    %84 = vector.shape_cast %83 : vector<1x1x16xf32> to vector<1x16xf32>
    %85 = vector.broadcast %84 : vector<1x16xf32> to vector<16x16xf32>
    %86 = arith.addf %82, %85 : vector<16x16xf32>
    %87 = math.tanh %86 : vector<16x16xf32>
    %88 = arith.truncf %87 : vector<16x16xf32> to vector<16x16xbf16>
    %c2_49 = arith.constant 2 : index
    %c0_50 = arith.constant 0 : index
    %c0_51 = arith.constant 0 : index
    %89 = vector.load %arg4[%c2_49, %c0_50, %c0_51] : memref<3x16x48xbf16, #tpu.memory_space<vmem>>, vector<1x16x48xbf16>
    %90 = vector.shape_cast %89 : vector<1x16x48xbf16> to vector<16x48xbf16>
    %cst_52 = arith.constant dense<0.000000e+00> : vector<16x48xf32>
    %91 = tpu.matmul %88, %90, %cst_52 {dimension_numbers = #tpu.dot_dimension_numbers<[1], [0], [0], [1], [0, 0, 1, 1], [], []>} : vector<16x16xbf16>, vector<16x48xbf16>, vector<16x48xf32> -> vector<16x48xf32>
    %c2_53 = arith.constant 2 : index
    %c0_54 = arith.constant 0 : index
    %c0_55 = arith.constant 0 : index
    %92 = vector.load %arg5[%c2_53, %c0_54, %c0_55] : memref<3x1x48xf32, #tpu.memory_space<vmem>>, vector<1x1x48xf32>
    %93 = vector.shape_cast %92 : vector<1x1x48xf32> to vector<1x48xf32>
    %94 = vector.broadcast %93 : vector<1x48xf32> to vector<16x48xf32>
    %95 = arith.addf %91, %94 : vector<16x48xf32>
    %96 = vector.extract_strided_slice %95 {offsets = [0, 0], sizes = [16, 16], strides = [1, 1]} : vector<16x48xf32> to vector<16x16xf32>
    %97 = vector.extract_strided_slice %95 {offsets = [0, 16], sizes = [16, 16], strides = [1, 1]} : vector<16x48xf32> to vector<16x16xf32>
    %98 = vector.extract_strided_slice %95 {offsets = [0, 32], sizes = [16, 16], strides = [1, 1]} : vector<16x48xf32> to vector<16x16xf32>
    %c2_56 = arith.constant 2 : index
    %c0_57 = arith.constant 0 : index
    %c0_58 = arith.constant 0 : index
    %99 = vector.load %arg6[%c2_56, %c0_57, %c0_58] : memref<3x1x16xf32, #tpu.memory_space<vmem>>, vector<1x1x16xf32>
    %100 = vector.shape_cast %99 : vector<1x1x16xf32> to vector<1x16xf32>
    %101 = vector.broadcast %100 : vector<1x16xf32> to vector<16x16xf32>
    %102 = arith.mulf %101, %98 : vector<16x16xf32>
    %cst_59 = arith.constant 1.000000e-01 : f32
    %103 = vector.broadcast %cst_59 : f32 to vector<16x16xf32>
    %104 = arith.mulf %103, %97 : vector<16x16xf32>
    %105 = arith.addf %102, %104 : vector<16x16xf32>
    %106 = arith.addf %96, %105 : vector<16x16xf32>
    %cst_60 = arith.constant dense<0.000000e+00> : vector<16xf32>
    %107 = vector.multi_reduction <add>, %106, %cst_60 [0] : vector<16x16xf32> to vector<16xf32>
    %108 = vector.shape_cast %107 : vector<16xf32> to vector<1x16xf32>
    %109 = arith.mulf %106, %106 : vector<16x16xf32>
    %cst_61 = arith.constant dense<0.000000e+00> : vector<16xf32>
    %110 = vector.multi_reduction <add>, %109, %cst_61 [0] : vector<16x16xf32> to vector<16xf32>
    %111 = vector.shape_cast %110 : vector<16xf32> to vector<1x16xf32>
    %112 = arith.mulf %105, %105 : vector<16x16xf32>
    %cst_62 = arith.constant dense<0.000000e+00> : vector<16xf32>
    %113 = vector.multi_reduction <add>, %112, %cst_62 [0] : vector<16x16xf32> to vector<16xf32>
    %114 = vector.shape_cast %113 : vector<16xf32> to vector<1x16xf32>
    %115 = arith.mulf %97, %97 : vector<16x16xf32>
    %cst_63 = arith.constant dense<0.000000e+00> : vector<16xf32>
    %116 = vector.multi_reduction <add>, %115, %cst_63 [0] : vector<16x16xf32> to vector<16xf32>
    %117 = vector.shape_cast %116 : vector<16xf32> to vector<1x16xf32>
    %118 = tpu.concatenate %30, %33, %36, %39, %69, %72, %75, %78, %108, %111, %114, %117 in 0 : vector<1x16xf32>, vector<1x16xf32>, vector<1x16xf32>, vector<1x16xf32>, vector<1x16xf32>, vector<1x16xf32>, vector<1x16xf32>, vector<1x16xf32>, vector<1x16xf32>, vector<1x16xf32>, vector<1x16xf32>, vector<1x16xf32> -> vector<12x16xf32>
    %119 = vector.shape_cast %118 : vector<12x16xf32> to vector<1x12x16xf32>
    %c0_64 = arith.constant 0 : index
    %c0_65 = arith.constant 0 : index
    %c0_66 = arith.constant 0 : index
    %120 = vector.load %arg10[%c0_64, %c0_65, %c0_66] : memref<1x12x16xf32, #tpu.memory_space<vmem>>, vector<1x12x16xf32>
    tpu.vector_store %arg10[%c0_64, %c0_65, %c0_66], %119 {strides = array<i32>} : memref<1x12x16xf32, #tpu.memory_space<vmem>>, vector<1x12x16xf32>,
    %121 = arith.truncf %106 : vector<16x16xf32> to vector<16x16xbf16>
    %c0_67 = arith.constant 0 : index
    %c0_68 = arith.constant 0 : index
    %122 = vector.load %arg7[%c0_67, %c0_68] : memref<16x16xbf16, #tpu.memory_space<vmem>>, vector<16x16xbf16>
    %cst_69 = arith.constant dense<0.000000e+00> : vector<16x16xf32>
    %123 = tpu.matmul %121, %122, %cst_69 {dimension_numbers = #tpu.dot_dimension_numbers<[1], [0], [0], [1], [0, 0, 1, 1], [], []>} : vector<16x16xbf16>, vector<16x16xbf16>, vector<16x16xf32> -> vector<16x16xf32>
    %c0_70 = arith.constant 0 : index
    %c0_71 = arith.constant 0 : index
    %124 = vector.load %arg8[%c0_70, %c0_71] : memref<1x16xf32, #tpu.memory_space<vmem>>, vector<1x16xf32>
    %125 = vector.broadcast %124 : vector<1x16xf32> to vector<16x16xf32>
    %126 = arith.addf %123, %125 : vector<16x16xf32>
    %c0_72 = arith.constant 0 : index
    %c0_73 = arith.constant 0 : index
    %127 = vector.load %arg9[%c0_72, %c0_73] : memref<16x16xf32, #tpu.memory_space<vmem>>, vector<16x16xf32>
    tpu.vector_store %arg9[%c0_72, %c0_73], %126 {strides = array<i32>} : memref<16x16xf32, #tpu.memory_space<vmem>>, vector<16x16xf32>,
    return
  }
  func.func @transform_0(%arg0: i32) -> (i32, i32) {
    %c0_i32 = arith.constant 0 : i32
    %c0_i32_0 = arith.constant 0 : i32
    return %arg0, %c0_i32 : i32, i32
  }
  func.func @transform_1(%arg0: i32) -> (i32, i32, i32) {
    %c0_i32 = arith.constant 0 : i32
    %c0_i32_0 = arith.constant 0 : i32
    %c0_i32_1 = arith.constant 0 : i32
    %c0_i32_2 = arith.constant 0 : i32
    return %c0_i32, %c0_i32_0, %c0_i32_1 : i32, i32, i32
  }
  func.func @transform_2(%arg0: i32) -> (i32, i32, i32) {
    %c0_i32 = arith.constant 0 : i32
    %c0_i32_0 = arith.constant 0 : i32
    %c0_i32_1 = arith.constant 0 : i32
    %c0_i32_2 = arith.constant 0 : i32
    return %c0_i32, %c0_i32_0, %c0_i32_1 : i32, i32, i32
  }
  func.func @transform_3(%arg0: i32) -> (i32, i32, i32) {
    %c0_i32 = arith.constant 0 : i32
    %c0_i32_0 = arith.constant 0 : i32
    %c0_i32_1 = arith.constant 0 : i32
    %c0_i32_2 = arith.constant 0 : i32
    return %c0_i32, %c0_i32_0, %c0_i32_1 : i32, i32, i32
  }
  func.func @transform_4(%arg0: i32) -> (i32, i32, i32) {
    %c0_i32 = arith.constant 0 : i32
    %c0_i32_0 = arith.constant 0 : i32
    %c0_i32_1 = arith.constant 0 : i32
    %c0_i32_2 = arith.constant 0 : i32
    return %c0_i32, %c0_i32_0, %c0_i32_1 : i32, i32, i32
  }
  func.func @transform_5(%arg0: i32) -> (i32, i32, i32) {
    %c0_i32 = arith.constant 0 : i32
    %c0_i32_0 = arith.constant 0 : i32
    %c0_i32_1 = arith.constant 0 : i32
    %c0_i32_2 = arith.constant 0 : i32
    return %c0_i32, %c0_i32_0, %c0_i32_1 : i32, i32, i32
  }
  func.func @transform_6(%arg0: i32) -> (i32, i32) {
    %c0_i32 = arith.constant 0 : i32
    %c0_i32_0 = arith.constant 0 : i32
    %c0_i32_1 = arith.constant 0 : i32
    return %c0_i32, %c0_i32_0 : i32, i32
  }
  func.func @transform_7(%arg0: i32) -> (i32, i32) {
    %c0_i32 = arith.constant 0 : i32
    %c0_i32_0 = arith.constant 0 : i32
    %c0_i32_1 = arith.constant 0 : i32
    return %c0_i32, %c0_i32_0 : i32, i32
  }
  func.func @transform_8(%arg0: i32) -> (i32, i32) {
    %c0_i32 = arith.constant 0 : i32
    %c0_i32_0 = arith.constant 0 : i32
    return %arg0, %c0_i32 : i32, i32
  }
  func.func @transform_9(%arg0: i32) -> (i32, i32, i32) {
    %c0_i32 = arith.constant 0 : i32
    %c0_i32_0 = arith.constant 0 : i32
    %c0_i32_1 = arith.constant 0 : i32
    return %arg0, %c0_i32, %c0_i32_0 : i32, i32, i32
  }
}

</mosaic_0001>

<bundles_post_ra>
// kernel: arithmetic_pattern_forward.1
= control target key start
LH: loop header
LB: loop body
LE: loop exit
PB: predicated region body
PF: predicated region fallthrough
CT: control target
= control target key end

     0   :  { %15 = vsyncpa [#allocation3], 0  ;;  %s1004_s0 = inlined_call_operand.hbm [shape: f32[16,16], index: 0, kind: input, shape index: {}]   ;;  %s1005_s1 = inlined_call_operand.hbm [shape: bf16[3,16,16], index: 1, kind: input, shape index: {}]   ;;  %s1006_s2 = inlined_call_operand.vmem [shape: f32[3,1,16], index: 2, kind: input, shape index: {}]   ;;  %s1007_s3 = inlined_call_operand.hbm [shape: bf16[3,16,48], index: 3, kind: input, shape index: {}]   ;;  %s1008_s4 = inlined_call_operand.hbm [shape: f32[3,1,48], index: 4, kind: input, shape index: {}]   ;;  %s1009_s5 = inlined_call_operand.vmem [shape: f32[3,1,16], index: 5, kind: input, shape index: {}]   ;;  %s1010_s6 = inlined_call_operand.vmem [shape: bf16[16,16], index: 6, kind: input, shape index: {}]   ;;  %s1011_s7 = inlined_call_operand.vmem [shape: f32[1,16], index: 7, kind: input, shape index: {}]   ;;  %s1012_s8 = inlined_call_operand.hbm [shape: f32[16,16], index: 8, kind: output, shape index: {0}]   ;;  %s1013_s9 = inlined_call_operand.vmem [shape: f32[1,12,16], index: 9, kind: output, shape index: {1}]  }
   0x1   :  { %16 = vsyncpa [#allocation6], 0 }
   0x2   :  { %17 = vsyncpa [#allocation9], 0  ;;  %s36_s11 = sshll.u32 %s1005_s1, 4  ;;  %s37_s11 = int_to_ptr.hbm [resolvable:$true] %s36_s11 }
   0x3   :  { %18 = vsyncpa [#allocation4], 0  ;;  %s804_s12 = smov [#allocation5]   ;;  %s23_s16 = sshll.u32 %s1004_s0, 4  ;;  %s24_s16 = int_to_ptr.hbm [resolvable:$true] %s23_s16 }
   0x4   :  { %s38_s13 = sshll.u32 %s804_s12, 4  ;;  %s805_s17 = smov 64   ;;  %s39_s13 = int_to_ptr.vmem [resolvable:$true] %s38_s13 }
   0x5   :  { %s806_s18 = smov 4   ;;  %s807_s19 = smov [#allocation2]  }
   0x6   :  { %44 = dma.hbm_to_vmem [thread:$0]  %s37_s11, 384, %s39_s13, [#allocation6], %s805_s17, %s805_s17, %s806_s18  }
   0x7   :  { %s25_s20 = sshll.u32 %s807_s19, 4  ;;  %s808_s21 = smov 128   ;;  %s26_s20 = int_to_ptr.vmem [resolvable:$true] %s25_s20 }
   0x8   :  { %s809_s22 = smov 8   ;;  %s51_s24 = sshll.u32 %s1007_s3, 4  ;;  %s52_s24 = int_to_ptr.hbm [resolvable:$true] %s51_s24 }
   0x9   :  { %31 = dma.hbm_to_vmem [thread:$0]  %s24_s16, 256, %s26_s20, [#allocation3], %s808_s21, %s808_s21, %s809_s22  }
   0xa   :  { %s810_s25 = smov [#allocation7]   ;;  %s64_s28 = sshll.u32 %s1008_s4, 4  ;;  %s65_s28 = int_to_ptr.hbm [resolvable:$true] %s64_s28 }
   0xb   :  { %s53_s0 = sshll.u32 %s810_s25, 4  ;;  %s811_s29 = smov [#allocation8]   ;;  %s54_s0 = int_to_ptr.vmem [resolvable:$true] %s53_s0 }
   0xc   :  { %59 = dma.hbm_to_vmem [thread:$0]  %s52_s24, 384, %s54_s0, [#allocation6], %s805_s17, %s805_s17, %s806_s18  }
   0xd   :  { %s66_s30 = sshll.u32 %s811_s29, 4  ;;  %s812_s10 = smov 16   ;;  %s67_s30 = int_to_ptr.vmem [resolvable:$true] %s66_s30 }
   0xe   :  { %s813_s11 = smov 1  }
   0xf   :  { %72 = dma.hbm_to_vmem [thread:$0]  %s65_s28, 48, %s67_s30, [#allocation9], %s812_s10, %s812_s10, %s813_s11  }
  0x10   :  { %796 = dma.done.wait [#allocation3], 256  }
  0x11   :  { %797 = vsyncadd [#allocation3], 4294967040 }
  0x12   :  { %798 = dma.done.wait [#allocation6], 768  }
  0x13   :  { %799 = vsyncadd [#allocation6], 4294966528 }
  0x14   :  { %800 = dma.done.wait [#allocation9], 48  }
  0x15   :  { %801 = vsyncadd [#allocation9], 4294967248  ;;  %v634_v0 = vld [vmem:[#allocation5] sm:$0xff]  ;;  %v96_v1 = vld [vmem:[#allocation2] sm:$0xff]  ;;  %vm111_vm0 = vcmask 130048   ;;  %s814_s12 = smov 96  }
  0x16   :  { %v97_v2 = vld [vmem:[#allocation2 + $0x8] sm:$0xff]  ;;  %122 = vmatpush.bf16.msra.mxu0 %v634_v0  ;;  %v654_v6 = vld [vmem:[%s1006_s2] ss:$0 sm:$0xff]  ;;  %s815_s13 = smov 112   ;;  %v636_v20 = vld [vmem:[#allocation5 + $0x8] sm:$0xff]  ;;  %vm518_vm1 = vcmask 1040384  }
  0x17   :  { %v98_v3 = vpack.c.bf16 %v97_v2, %v96_v1  ;;  %v635_v4 = vld [vmem:[#allocation7] sm:$0xff]  ;;  %v655_v13 = vld [vmem:[#allocation8] ss:$0 sm:$0xff]  ;;  %257 = vmatpush.bf16.msra.mxu2 %v636_v20  ;;  %vm520_vm2 = vcmask 1041408   ;;  %v637_v2 = vld [vmem:[#allocation7 + $0x8] sm:$0xff]  ;;  %vm222_vm3 = vcmask 261248  }
  0x18   :  { %154 = vmatpush.bf16.msra.mxu1 %v635_v4  ;;  %v656_v21 = vld [vmem:[%s1009_s5] ss:$0 sm:$0xff]  ;;  %291 = vmatpush.bf16.msra.mxu3 %v637_v2  ;;  %v657_v4 = vld [vmem:[%s1006_s2 + $0x1] ss:$0 sm:$0xff]  ;;  %vm522_vm4 = vcmask 1042432   ;;  %vm524_vm5 = vcmask 1043456  }
  0x19   :  { %599 = vmatmul.msk.bf16.vlgmr.msra.gmra.mxu0 %vm111_vm0, %v98_v3  ;;  %v638_v20 = vld [vmem:[#allocation5 + $0x10] sm:$0xff]  ;;  %vm526_vm6 = vcmask 1044480   ;;  %vm528_vm7 = vcmask 1045504   ;;  %vm530_vm8 = vcmask 1046528   ;;  %vm536_vm9 = vcmask 125952   ;;  %s816_s29 = smov [#allocation10]  }
  0x1a   :  { %394 = vmatpush.bf16.msrb.mxu0 %v638_v20  ;;  %s574_s30 = sshll.u32 %s816_s29, 4  ;;  %s576_s3 = sshll.u32 %s1012_s8, 4  ;;  %s575_s30 = int_to_ptr.vmem [resolvable:$true] %s574_s30  ;;  %s577_s3 = int_to_ptr.hbm [resolvable:$true] %s576_s3 }
  0x96   :  { %v124_v5 = vpop.f32.mrf.mxu0 }
  0x97   :  { %v125_v7 = vadd.f32 %v654_v6, %v124_v5 }
  0x99   :  { %664 = vtanh.f32 %v125_v7 }
  0x9e   :  { %v126_v8 = vpop.f32.mrf.mxu0 }
  0x9f   :  { %v127_v9 = vadd.f32 %v654_v6, %v126_v8  ;;  %v665_v10 = vpop.eup %664 }
  0xa1   :  { %666 = vtanh.f32 %v127_v9 }
  0xa7   :  { %v667_v11 = vpop.eup %666 }
  0xa8   :  { %v131_v12 = vpack.c.bf16 %v667_v11, %v665_v10  ;;  %v658_v11 = vld [vmem:[#allocation8 + $0x1] ss:$0 sm:$0xff] }
  0xaa   :  { %604 = vmatmul.msk.bf16.vlgmr.msra.gmra.mxu1 %vm111_vm0, %v131_v12 }
 0x127   :  { %v156_v14 = vpop.f32.mrf.mxu1 }
 0x128   :  { %v887_v15 = vadd.f32 %v655_v13, %v156_v14 }
 0x12a   :  { %167 = vrot.lane.b32.xlu0 %v887_v15, %s814_s12  ;;  %v175_v16 = vmul.f32 0.1, %v887_v15 }
 0x12c   :  { %179 = vrot.lane.b32.xlu1 %v175_v16, %s815_s13 }
 0x12f   :  { %v158_v17 = vpop.f32.mrf.mxu1 }
 0x130   :  { %v893_v18 = vadd.f32 %v655_v13, %v158_v17 }
 0x132   :  { %169 = vrot.lane.b32.xlu0 %v893_v18, %s814_s12  ;;  %v176_v19 = vmul.f32 0.1, %v893_v18 }
 0x134   :  { %181 = vrot.lane.b32.xlu1 %v176_v19, %s815_s13 }
 0x19c   :  { %v168_v22 = vpop.permute.xlu0 %167 }
 0x19d   :  { %v173_v23 = vmul.f32 %v656_v21, %v168_v22  ;;  %v659_v22 = vld [vmem:[%s1009_s5 + $0x1] ss:$0 sm:$0xff] }
 0x19e   :  { %v180_v24 = vpop.permute.xlu1 %179 }
 0x19f   :  { %v185_v25 = vadd.f32 %v180_v24, %v173_v23 }
 0x1a1   :  { %v187_v27 = vadd.f32 %v185_v25, %v887_v15  ;;  %v209_v29 = vmul.f32 %v185_v25, %v185_v25 }
 0x1a3   :  { %v198_v32 = vmul.f32 %v187_v27, %v187_v27  ;;  %v189_v35 = vsel %vm111_vm0, %v187_v27, 0.0  ;;  %v211_v36 = vsel %vm111_vm0, %v209_v29, 0.0 }
 0x1a4   :  { %v170_v26 = vpop.permute.xlu0 %169 }
 0x1a5   :  { %v174_v28 = vmul.f32 %v656_v21, %v170_v26  ;;  %v200_v43 = vsel %vm111_vm0, %v198_v32, 0.0 }
 0x1a6   :  { %v182_v30 = vpop.permute.xlu1 %181 }
 0x1a7   :  { %v186_v31 = vadd.f32 %v182_v30, %v174_v28 }
 0x1a9   :  { %v188_v33 = vadd.f32 %v186_v31, %v893_v18  ;;  %v210_v34 = vmul.f32 %v186_v31, %v186_v31 }
 0x1ab   :  { %v190_v37 = vsel %vm111_vm0, %v188_v33, 0.0  ;;  %v199_v38 = vmul.f32 %v188_v33, %v188_v33  ;;  %v212_v39 = vsel %vm111_vm0, %v210_v34, 0.0  ;;  %v232_v40 = vpack.c.bf16 %v188_v33, %v187_v27 }
 0x1ac   :  { %v191_v41 = vadd.f32 %v190_v37, %v189_v35  ;;  %v213_v42 = vadd.f32 %v212_v39, %v211_v36 }
 0x1ad   :  { %v201_v44 = vsel %vm111_vm0, %v199_v38, 0.0  ;;  %610 = vmatmul.msk.bf16.vlgmr.msra.gmra.mxu2 %vm111_vm0, %v232_v40 }
 0x1ae   :  { %v192_v45 = vrot.slane %v191_v41, 4  ;;  %v202_v46 = vadd.f32 %v201_v44, %v200_v43  ;;  %v214_v47 = vrot.slane %v213_v42, 4 }
 0x1b0   :  { %v193_v48 = vadd.f32 %v192_v45, %v191_v41  ;;  %v203_v49 = vrot.slane %v202_v46, 4  ;;  %v215_v50 = vadd.f32 %v214_v47, %v213_v42 }
 0x1b2   :  { %v194_v51 = vrot.slane %v193_v48, 2  ;;  %v204_v52 = vadd.f32 %v203_v49, %v202_v46  ;;  %v216_v53 = vrot.slane %v215_v50, 2  ;;  %v639_v46 = vld [vmem:[#allocation7 + $0x10] sm:$0xff] }
 0x1b3   :  { %428 = vmatpush.bf16.msrb.mxu1 %v639_v46 }
 0x1b4   :  { %v195_v54 = vadd.f32 %v194_v51, %v193_v48  ;;  %v205_v55 = vrot.slane %v204_v52, 2  ;;  %v217_v56 = vadd.f32 %v216_v53, %v215_v50  ;;  %v660_v48 = vld [vmem:[%s1006_s2 + $0x2] ss:$0 sm:$0xff] }
 0x1b6   :  { %v196_v57 = vrot.slane %v195_v54, 1  ;;  %v206_v58 = vadd.f32 %v205_v55, %v204_v52  ;;  %v218_v59 = vrot.slane %v217_v56, 1 }
 0x1b8   :  { %v207_v60 = vrot.slane %v206_v58, 1  ;;  %v197_v61 = vadd.f32 %v196_v57, %v195_v54  ;;  %v219_v63 = vadd.f32 %v218_v59, %v217_v56 }
 0x1ba   :  { %v208_v62 = vadd.f32 %v207_v60, %v206_v58  ;;  %v221_v58 = vmul.f32 %v893_v18, %v893_v18 }
 0x1bc   :  { %v519_v0 = vsel %vm518_vm1, %v197_v61, %v208_v62  ;;  %v220_v61 = vmul.f32 %v887_v15, %v887_v15  ;;  %v224_v62 = vsel %vm222_vm3, %v221_v58, 0.0 }
 0x1bd   :  { %v913_v1 = vsel %vm520_vm2, %v519_v0, %v219_v63 }
 0x1be   :  { %v223_v0 = vsel %vm222_vm3, %v220_v61, 0.0 }
 0x1bf   :  { %v225_v2 = vadd.f32 %v224_v62, %v223_v0 }
 0x230   :  { %v259_v3 = vpop.f32.mrf.mxu2 }
 0x231   :  { %v260_v5 = vadd.f32 %v657_v4, %v259_v3 }
 0x233   :  { %668 = vtanh.f32 %v260_v5  ;;  %v226_v5 = vrot.slane %v225_v2, 4 }
 0x238   :  { %v261_v6 = vpop.f32.mrf.mxu2 }
 0x239   :  { %v262_v7 = vadd.f32 %v657_v4, %v261_v6  ;;  %v669_v8 = vpop.eup %668  ;;  %v661_v4 = vld [vmem:[#allocation8 + $0x2] ss:$0 sm:$0xff] }
 0x23b   :  { %670 = vtanh.f32 %v262_v7 }
 0x241   :  { %v671_v9 = vpop.eup %670 }
 0x242   :  { %v266_v10 = vpack.c.bf16 %v671_v9, %v669_v8  ;;  %v227_v9 = vadd.f32 %v226_v5, %v225_v2 }
 0x244   :  { %615 = vmatmul.msk.bf16.vlgmr.msra.gmra.mxu3 %vm111_vm0, %v266_v10  ;;  %v228_v15 = vrot.slane %v227_v9, 2 }
 0x2c7   :  { %v293_v12 = vpop.f32.mrf.mxu3 }
 0x2c8   :  { %v294_v13 = vadd.f32 %v658_v11, %v293_v12 }
 0x2ca   :  { %305 = vrot.lane.b32.xlu2 %v294_v13, %s814_s12  ;;  %v313_v14 = vmul.f32 0.1, %v294_v13  ;;  %v358_v56 = vmul.f32 %v294_v13, %v294_v13 }
 0x2cc   :  { %317 = vrot.lane.b32.xlu0 %v313_v14, %s815_s13  ;;  %v360_v59 = vsel %vm222_vm3, %v358_v56, 0.0 }
 0x2cf   :  { %v295_v16 = vpop.f32.mrf.mxu3 }
 0x2d0   :  { %v296_v17 = vadd.f32 %v658_v11, %v295_v16  ;;  %v229_v16 = vadd.f32 %v228_v15, %v227_v9 }
 0x2d2   :  { %307 = vrot.lane.b32.xlu2 %v296_v17, %s814_s12  ;;  %v314_v19 = vmul.f32 0.1, %v296_v17  ;;  %v359_v55 = vmul.f32 %v296_v17, %v296_v17 }
 0x2d4   :  { %319 = vrot.lane.b32.xlu1 %v314_v19, %s815_s13  ;;  %v361_v57 = vsel %vm222_vm3, %v359_v55, 0.0 }
 0x2d5   :  { %v362_v60 = vadd.f32 %v361_v57, %v360_v59 }
 0x2d7   :  { %v363_v63 = vrot.slane %v362_v60, 4 }
 0x2d9   :  { %v364_v3 = vadd.f32 %v363_v63, %v362_v60 }
 0x2db   :  { %v365_v6 = vrot.slane %v364_v3, 2 }
 0x2dd   :  { %v366_v10 = vadd.f32 %v365_v6, %v364_v3 }
 0x2df   :  { %v367_v11 = vrot.slane %v366_v10, 1 }
 0x2e1   :  { %v368_v20 = vadd.f32 %v367_v11, %v366_v10 }
 0x324   :  { %v306_v21 = vpop.permute.xlu2 %305 }
 0x325   :  { %v311_v24 = vmul.f32 %v659_v22, %v306_v21 }
 0x32c   :  { %v308_v26 = vpop.permute.xlu2 %307 }
 0x32d   :  { %v312_v27 = vmul.f32 %v659_v22, %v308_v26 }
 0x33e   :  { %v318_v23 = vpop.permute.xlu0 %317 }
 0x33f   :  { %v323_v25 = vadd.f32 %v318_v23, %v311_v24  ;;  %v230_v23 = vrot.slane %v229_v16, 1 }
 0x341   :  { %v325_v28 = vadd.f32 %v323_v25, %v294_v13  ;;  %v347_v29 = vmul.f32 %v323_v25, %v323_v25  ;;  %v231_v26 = vadd.f32 %v230_v23, %v229_v16 }
 0x343   :  { %v336_v32 = vmul.f32 %v325_v28, %v325_v28  ;;  %v327_v35 = vsel %vm111_vm0, %v325_v28, 0.0  ;;  %v349_v36 = vsel %vm111_vm0, %v347_v29, 0.0 }
 0x345   :  { %v338_v43 = vsel %vm111_vm0, %v336_v32, 0.0  ;;  %v640_v32 = vld [vmem:[%s1010_s6] sm:$0xff] }
 0x346   :  { %v320_v30 = vpop.permute.xlu1 %319  ;;  %561 = vmatpush.bf16.msrb.mxu2 %v640_v32 }
 0x347   :  { %v324_v31 = vadd.f32 %v320_v30, %v312_v27 }
 0x349   :  { %v326_v33 = vadd.f32 %v324_v31, %v296_v17  ;;  %v348_v34 = vmul.f32 %v324_v31, %v324_v31 }
 0x34b   :  { %v328_v37 = vsel %vm111_vm0, %v326_v33, 0.0  ;;  %v337_v38 = vmul.f32 %v326_v33, %v326_v33  ;;  %v350_v39 = vsel %vm111_vm0, %v348_v34, 0.0  ;;  %v369_v40 = vpack.c.bf16 %v326_v33, %v325_v28 }
 0x34c   :  { %v930_v41 = vadd.f32 %v328_v37, %v327_v35  ;;  %v932_v42 = vadd.f32 %v350_v39, %v349_v36  ;;  %v662_v39 = vld [vmem:[%s1009_s5 + $0x2] ss:$0 sm:$0xff] }
 0x34d   :  { %v339_v44 = vsel %vm111_vm0, %v337_v38, 0.0  ;;  %622 = vmatmul.msk.bf16.vlgmr.msrb.gmra.mxu0 %vm111_vm0, %v369_v40 }
 0x34e   :  { %v937_v45 = vadd.f32 %v339_v44, %v338_v43  ;;  %v330_v33 = vrot.slane %v930_v41, 4  ;;  %v352_v34 = vrot.slane %v932_v42, 4 }
 0x350   :  { %v341_v35 = vrot.slane %v937_v45, 4  ;;  %v331_v36 = vadd.f32 %v330_v33, %v930_v41  ;;  %v353_v37 = vadd.f32 %v352_v34, %v932_v42 }
 0x352   :  { %v342_v38 = vadd.f32 %v341_v35, %v937_v45  ;;  %v332_v40 = vrot.slane %v331_v36, 2  ;;  %v354_v43 = vrot.slane %v353_v37, 2 }
 0x354   :  { %v343_v46 = vrot.slane %v342_v38, 2 }
 0x3ca   :  { %v396_v47 = vpop.f32.mrf.mxu0 }
 0x3cb   :  { %v397_v49 = vadd.f32 %v660_v48, %v396_v47 }
 0x3cd   :  { %672 = vtanh.f32 %v397_v49  ;;  %v355_v49 = vadd.f32 %v354_v43, %v353_v37  ;;  %v663_v43 = vld [vmem:[%s1011_s7] ss:$0 sm:$0xff] }
 0x3d2   :  { %v398_v50 = vpop.f32.mrf.mxu0 }
 0x3d3   :  { %v399_v51 = vadd.f32 %v660_v48, %v398_v50  ;;  %v673_v52 = vpop.eup %672  ;;  %v333_v50 = vadd.f32 %v332_v40, %v331_v36 }
 0x3d5   :  { %674 = vtanh.f32 %v399_v51 }
 0x3db   :  { %v675_v53 = vpop.eup %674 }
 0x3dc   :  { %v403_v54 = vpack.c.bf16 %v675_v53, %v673_v52  ;;  %v344_v52 = vadd.f32 %v343_v46, %v342_v38  ;;  %v356_v53 = vrot.slane %v355_v49, 1 }
 0x3de   :  { %627 = vmatmul.msk.bf16.vlgmr.msrb.gmra.mxu1 %vm111_vm0, %v403_v54  ;;  %v334_v54 = vrot.slane %v333_v50, 1  ;;  %v345_v45 = vrot.slane %v344_v52, 1  ;;  %v357_v59 = vadd.f32 %v356_v53, %v355_v49 }
 0x3e0   :  { %v335_v60 = vadd.f32 %v334_v54, %v333_v50  ;;  %v346_v0 = vadd.f32 %v345_v45, %v344_v52 }
 0x45b   :  { %v430_v7 = vpop.f32.mrf.mxu1 }
 0x45c   :  { %v431_v8 = vadd.f32 %v661_v4, %v430_v7 }
 0x45e   :  { %442 = vrot.lane.b32.xlu2 %v431_v8, %s814_s12  ;;  %v450_v18 = vmul.f32 0.1, %v431_v8  ;;  %v495_v13 = vmul.f32 %v431_v8, %v431_v8 }
 0x460   :  { %454 = vrot.lane.b32.xlu1 %v450_v18, %s815_s13  ;;  %v497_v21 = vsel %vm222_vm3, %v495_v13, 0.0 }
 0x463   :  { %v432_v12 = vpop.f32.mrf.mxu1 }
 0x464   :  { %v433_v14 = vadd.f32 %v661_v4, %v432_v12 }
 0x466   :  { %v496_v17 = vmul.f32 %v433_v14, %v433_v14  ;;  %444 = vrot.lane.b32.xlu0 %v433_v14, %s814_s12  ;;  %v451_v19 = vmul.f32 0.1, %v433_v14 }
 0x468   :  { %v498_v22 = vsel %vm222_vm3, %v496_v17, 0.0  ;;  %456 = vrot.lane.b32.xlu2 %v451_v19, %s815_s13  ;;  %511 = vrot.lane.b32.xlu1 %v368_v20, %s815_s13 }
 0x469   :  { %v499_v24 = vadd.f32 %v498_v22, %v497_v21 }
 0x46b   :  { %v500_v25 = vrot.slane %v499_v24, 4 }
 0x46d   :  { %v501_v27 = vadd.f32 %v500_v25, %v499_v24 }
 0x46e   :  { %507 = vrot.lane.b32.xlu0 %v231_v26, %s815_s13 }
 0x46f   :  { %v502_v28 = vrot.slane %v501_v27, 2 }
 0x471   :  { %v503_v29 = vadd.f32 %v502_v28, %v501_v27 }
 0x473   :  { %v504_v30 = vrot.slane %v503_v29, 1 }
 0x475   :  { %v505_v31 = vadd.f32 %v504_v30, %v503_v29 }
 0x477   :  { %515 = vrot.lane.b32.xlu2 %v505_v31, %s815_s13 }
 0x4b8   :  { %v443_v44 = vpop.permute.xlu2 %442 }
 0x4b9   :  { %v448_v48 = vmul.f32 %v662_v39, %v443_v44 }
 0x4c2   :  { %v457_v56 = vpop.permute.xlu2 %456 }
 0x4d1   :  { %v516_v38 = vpop.permute.xlu2 %515 }
 0x4d2   :  { %v455_v47 = vpop.permute.xlu1 %454 }
 0x4d3   :  { %v460_v51 = vadd.f32 %v455_v47, %v448_v48 }
 0x4d5   :  { %v462_v42 = vadd.f32 %v460_v51, %v431_v8  ;;  %v484_v57 = vmul.f32 %v460_v51, %v460_v51 }
 0x4d7   :  { %v473_v61 = vmul.f32 %v462_v42, %v462_v42  ;;  %v464_v2 = vsel %vm111_vm0, %v462_v42, 0.0  ;;  %v486_v3 = vsel %vm111_vm0, %v484_v57, 0.0 }
 0x4d8   :  { %v445_v41 = vpop.permute.xlu0 %444 }
 0x4d9   :  { %v449_v55 = vmul.f32 %v662_v39, %v445_v41  ;;  %v475_v10 = vsel %vm111_vm0, %v473_v61, 0.0 }
 0x4da   :  { %v512_v22 = vpop.permute.xlu1 %511 }
 0x4db   :  { %v461_v58 = vadd.f32 %v457_v56, %v449_v55 }
 0x4dd   :  { %v463_v62 = vadd.f32 %v461_v58, %v433_v14  ;;  %v485_v63 = vmul.f32 %v461_v58, %v461_v58 }
 0x4df   :  { %v465_v4 = vsel %vm111_vm0, %v463_v62, 0.0  ;;  %v474_v5 = vmul.f32 %v463_v62, %v463_v62  ;;  %v487_v6 = vsel %vm111_vm0, %v485_v63, 0.0  ;;  %v538_v7 = vpack.c.bf16 %v463_v62, %v462_v42 }
 0x4e0   :  { %v466_v8 = vadd.f32 %v465_v4, %v464_v2  ;;  %v488_v9 = vadd.f32 %v487_v6, %v486_v3  ;;  %v508_v18 = vpop.permute.xlu0 %507 }
 0x4e1   :  { %v476_v15 = vsel %vm111_vm0, %v474_v5, 0.0  ;;  %v523_v11 = vsel %vm522_vm4, %v913_v1, %v508_v18  ;;  %633 = vmatmul.msk.bf16.vlgmr.msrb.gmra.mxu2 %vm111_vm0, %v538_v7 }
 0x4e2   :  { %v467_v12 = vrot.slane %v466_v8, 4  ;;  %v477_v13 = vadd.f32 %v476_v15, %v475_v10  ;;  %v489_v14 = vrot.slane %v488_v9, 4  ;;  %v525_v16 = vsel %vm524_vm5, %v523_v11, %v335_v60 }
 0x4e3   :  { %v527_v17 = vsel %vm526_vm6, %v525_v16, %v346_v0 }
 0x4e4   :  { %v468_v19 = vadd.f32 %v467_v12, %v466_v8  ;;  %v478_v20 = vrot.slane %v477_v13, 4  ;;  %v490_v21 = vadd.f32 %v489_v14, %v488_v9  ;;  %v529_v23 = vsel %vm528_vm7, %v527_v17, %v357_v59 }
 0x4e5   :  { %v531_v24 = vsel %vm530_vm8, %v529_v23, %v512_v22 }
 0x4e6   :  { %v469_v25 = vrot.slane %v468_v19, 2  ;;  %v479_v26 = vadd.f32 %v478_v20, %v477_v13  ;;  %v491_v27 = vrot.slane %v490_v21, 2  ;;  %535 = vst.msk [vmem:[%s1013_s9] sm:$0xff] %vm111_vm0, %v531_v24 }
 0x4e8   :  { %v470_v1 = vadd.f32 %v469_v25, %v468_v19  ;;  %v480_v28 = vrot.slane %v479_v26, 2  ;;  %v492_v29 = vadd.f32 %v491_v27, %v490_v21 }
 0x4ea   :  { %v471_v30 = vrot.slane %v470_v1, 1  ;;  %v481_v31 = vadd.f32 %v480_v28, %v479_v26  ;;  %v493_v32 = vrot.slane %v492_v29, 1 }
 0x4ec   :  { %v482_v33 = vrot.slane %v481_v31, 1  ;;  %v472_v34 = vadd.f32 %v471_v30, %v470_v1  ;;  %v494_v36 = vadd.f32 %v493_v32, %v492_v29 }
 0x4ee   :  { %v483_v35 = vadd.f32 %v482_v33, %v481_v31 }
 0x4f0   :  { %v532_v37 = vsel %vm518_vm1, %v472_v34, %v483_v35 }
 0x4f1   :  { %v533_v39 = vsel %vm520_vm2, %v532_v37, %v494_v36 }
 0x4f2   :  { %v534_v40 = vsel %vm522_vm4, %v533_v39, %v516_v38 }
 0x4f3   :  { %537 = vst.msk [vmem:[%s1013_s9 + $0x8] sm:$0xf] %vm536_vm9, %v534_v40 }
 0x564   :  { %v563_v44 = vpop.f32.mrf.mxu2 }
 0x565   :  { %v564_v46 = vadd.f32 %v663_v43, %v563_v44 }
 0x567   :  { %568 = vst.msk [vmem:[#allocation10] sm:$0xff] %vm111_vm0, %v564_v46 }
 0x56c   :  { %v565_v47 = vpop.f32.mrf.mxu2 }
 0x56d   :  { %v566_v48 = vadd.f32 %v663_v43, %v565_v47 }
 0x56f   :  { %569 = vst.msk [vmem:[#allocation10 + $0x8] sm:$0xff] %vm111_vm0, %v566_v48 }
 0x570   :  { %582 = dma.vmem_to_hbm [thread:$0]  %s575_s30, 256, %s577_s3, [#allocation4], %s808_s21, %s808_s21, %s809_s22  }
 0x571   :  { %802 = dma.done.wait [#allocation4], 256  }
 0x572   :  { %803 = vsyncadd [#allocation4], 4294967040 }
 0x573   :  { %591 = vsyncpa [#allocation3], 1 }
 0x574   :  { %592 = vsyncpa [#allocation6], 1 }
 0x575   :  { %593 = vsyncpa [#allocation9], 1 }
 0x576   :  { %594 = vsyncpa [#allocation4], 1 }

</bundles_post_ra>
